<compile_context>
chip_gen: v7x
topology: tpu7x:2x2x1
jax: 0.10.0
libtpu: 0.0.40
codegen_flags: <defaults>
</compile_context>

<pallas_src>
import jax
import jax.numpy as jnp
from jax.experimental import pallas as pl
from jax.experimental.pallas import tpu as pltpu

_LANE = 128
# ~2 MiB f32 blocks: ~85% of HBM roofline on v6e in measured sweeps while
# 4 double-buffered in+out copies stay far under v7x's 64 MiB per-TC VMEM.
_TARGET_BLOCK_BYTES = 2 << 20
# Below this total size, per-grid-step overhead dominates -> single block.
_TINY_BYTES = 1 << 20


def _stable_softmax_kernel(x_ref, o_ref):
    # Block: (M, bn). Softmax along axis 0 (the reduction axis), f32 compute.
    x = x_ref[...].astype(jnp.float32)
    col_max = jnp.max(x, axis=0, keepdims=True)      # per-column max (XLU)
    e = jnp.exp(x - col_max)                          # EUP exp
    denom = jnp.sum(e, axis=0, keepdims=True)         # reduce over dim 0
    # Exact division: memory-bound kernel, so this is free and keeps
    # PyTorch-parity numerics (columns sum to 1 within f32 rounding).
    o_ref[...] = (e / denom).astype(o_ref.dtype)


def _pick_block_n(M: int, n_padded: int) -> int:
    """Byte-budget lane-dense block width: multiple of 128, divides n_padded."""
    bn = _TARGET_BLOCK_BYTES // max(1, 4 * M)          # f32 compute footprint
    bn = min(n_padded, max(_LANE, (bn // _LANE) * _LANE))
    while n_padded % bn != 0:                          # terminates at 128
        bn -= _LANE
    return bn


def stable_softmax(x: jax.Array) -> jax.Array:
    """Pallas TPU implementation of the PyTorch stable_softmax forward (2-D input)."""
    M, N = x.shape

    # Lane-dense padding: keep output stores unmasked (full 128-lane vst).
    n_pad = (-N) % _LANE
    xp = jnp.pad(x, ((0, 0), (0, n_pad))) if n_pad else x
    n_padded = N + n_pad

    total_bytes = M * n_padded * 4
    if total_bytes <= _TINY_BYTES:
        bn = n_padded                                  # tiny-array fast path
    else:
        bn = _pick_block_n(M, n_padded)
    grid = (n_padded // bn,)

    block_bytes = M * bn * 4
    # in + out, each double-buffered => 4 blocks, plus headroom; cap well under
    # v7x's 64 MiB per-TC physical VMEM.
    vmem_limit = int(min(48 << 20, max(16 << 20, 4 * block_bytes + (4 << 20))))

    cost = pl.CostEstimate(
        flops=4 * M * n_padded,
        transcendentals=M * n_padded,
        bytes_accessed=2 * M * n_padded * x.dtype.itemsize,
    )

    out = pl.pallas_call(
        _stable_softmax_kernel,
        out_shape=jax.ShapeDtypeStruct((M, n_padded), x.dtype),
        grid_spec=pltpu.PrefetchScalarGridSpec(
            num_scalar_prefetch=0,
            grid=grid,
            in_specs=[pl.BlockSpec((M, bn), lambda j: (0, j))],
            out_specs=pl.BlockSpec((M, bn), lambda j: (0, j)),
        ),
        compiler_params=pltpu.CompilerParams(
            # Column tiles are independent -> shard across TCs where available.
            dimension_semantics=("parallel",),
            vmem_limit_bytes=vmem_limit,
        ),
        cost_estimate=cost,
    )(xp)

    return out[:, :N] if n_pad else out


def _reference(x: jax.Array) -> jax.Array:
    # Literal PyTorch semantics: global max stabilizer, sum over dim 0.
    x32 = x.astype(jnp.float32)
    e = jnp.exp(x32 - jnp.max(x32))
    return (e / jnp.sum(e, axis=0, keepdims=True)).astype(x.dtype)


if __name__ == "__main__":
    key = jax.random.PRNGKey(0)

    # Small shape consistent with the module: seq=8 rows (reduction axis),
    # hidden=512 columns (lane axis). Uses the tiny-array single-block path.
    x = jax.random.normal(key, (8, 512), dtype=jnp.float32)
    out = stable_softmax(x)
    jax.block_until_ready(out)

    ref = _reference(x)
    assert out.shape == x.shape and out.dtype == x.dtype
    assert jnp.allclose(out, ref, atol=1e-5, rtol=1e-5), "mismatch vs reference"
    assert jnp.allclose(jnp.sum(out, axis=0), jnp.ones((512,)), atol=1e-5)

    # Ragged-N case: exercises the pad-to-128 / slice path.
    x2 = jax.random.normal(jax.random.PRNGKey(1), (8, 200), dtype=jnp.float32)
    out2 = stable_softmax(x2)
    jax.block_until_ready(out2)
    ref2 = _reference(x2)
    assert out2.shape == x2.shape
    assert jnp.allclose(out2, ref2, atol=1e-5, rtol=1e-5), "ragged-N mismatch"

    print("KERNEL_OK")
</pallas_src>

<mosaic_0001>
module attributes {stable_mosaic.version = 11 : i64} {
  func.func @_stable_softmax_kernel(%arg0: i32, %arg1: memref<8x512xf32, #tpu.memory_space<vmem>>, %arg2: memref<8x512xf32, #tpu.memory_space<vmem>>) attributes {dimension_semantics = [#tpu.dimension_semantics<parallel>], iteration_bounds = array<i64: 1>, scalar_prefetch = 0 : i64, scratch_operands = 0 : i64, tpu.core_type = #tpu.core_type<tc>, window_params = [{transform_indices = @transform_0, window_bounds = array<i64: 8, 512>}, {transform_indices = @transform_1, window_bounds = array<i64: 8, 512>}]} {
    %c0 = arith.constant 0 : index
    %c0_0 = arith.constant 0 : index
    %0 = vector.load %arg1[%c0, %c0_0] : memref<8x512xf32, #tpu.memory_space<vmem>>, vector<8x512xf32>
    %cst = arith.constant dense<0xFF800000> : vector<512xf32>
    %1 = vector.multi_reduction <maximumf>, %0, %cst [0] : vector<8x512xf32> to vector<512xf32>
    %2 = vector.shape_cast %1 : vector<512xf32> to vector<1x512xf32>
    %3 = vector.broadcast %2 : vector<1x512xf32> to vector<8x512xf32>
    %4 = arith.subf %0, %3 : vector<8x512xf32>
    %5 = math.exp %4 : vector<8x512xf32>
    %cst_1 = arith.constant dense<0.000000e+00> : vector<512xf32>
    %6 = vector.multi_reduction <add>, %5, %cst_1 [0] : vector<8x512xf32> to vector<512xf32>
    %7 = vector.shape_cast %6 : vector<512xf32> to vector<1x512xf32>
    %8 = vector.broadcast %7 : vector<1x512xf32> to vector<8x512xf32>
    %9 = arith.divf %5, %8 : vector<8x512xf32>
    %c0_2 = arith.constant 0 : index
    %c0_3 = arith.constant 0 : index
    %10 = vector.load %arg2[%c0_2, %c0_3] : memref<8x512xf32, #tpu.memory_space<vmem>>, vector<8x512xf32>
    tpu.vector_store %arg2[%c0_2, %c0_3], %9 {strides = array<i32>} : memref<8x512xf32, #tpu.memory_space<vmem>>, vector<8x512xf32>,
    return
  }
  func.func @transform_0(%arg0: i32) -> (i32, i32) {
    %c0_i32 = arith.constant 0 : i32
    %c0_i32_0 = arith.constant 0 : i32
    return %c0_i32, %arg0 : i32, i32
  }
  func.func @transform_1(%arg0: i32) -> (i32, i32) {
    %c0_i32 = arith.constant 0 : i32
    %c0_i32_0 = arith.constant 0 : i32
    return %c0_i32, %arg0 : i32, i32
  }
}

</mosaic_0001>

<bundles_post_ra>
// kernel: tpu_custom_call.1
= control target key start
LH: loop header
LB: loop body
LE: loop exit
PB: predicated region body
PF: predicated region fallthrough
CT: control target
= control target key end

     0   :  { %6 = vsyncpa [#allocation3], 0  ;;  %s214_s0 = inlined_call_operand.hbm [shape: f32[8,512], index: 0, kind: input, shape index: {}]   ;;  %s215_s1 = inlined_call_operand.hbm [shape: f32[8,512], index: 1, kind: output, shape index: {}]  }
   0x1   :  { %7 = vsyncpa [#allocation4], 0  ;;  %s178_s6 = smov [#allocation2]   ;;  %s130_s10 = scalar_lea.hbm %s214_s0, 512 }
   0x2   :  { %s14_s7 = sshll.u32 %s178_s6, 4  ;;  %p131_p0 = scmp.ne.s32.totalorder %s214_s0, %s130_s10  ;;  %s15_s7 = int_to_ptr.vmem [resolvable:$true] %s14_s7 }
   0x3   :  { %p134_p1 = scmp.lt.u32.totalorder %s130_s10, %s214_s0 }
   0x5   :  { %p136_p2 = pnand %p134_p1, %p131_p0 }
   0x7   :  { %139 = shalt.err (!%p136_p2)
}
   0x8   :  { %s140_s15 = scalar_lea.vmem %s15_s7, 512  ;;  %p145_p4 = scmp.lt.s32.totalorder %s15_s7, %s15_s7 }
   0x9   :  { %p141_p3 = scmp.ne.s32.totalorder %s15_s7, %s140_s15  ;;  %p146_p5 = scmp.lt.s32.totalorder %s140_s15, %s140_s15 }
   0xb   :  { %p147_p6 = por %p146_p5, %p145_p4 }
   0xd   :  { %p148_p7 = pnand %p147_p6, %p141_p3 }
   0xf   :  { %151 = shalt.err (!%p148_p7)
}
  0x10   :  { %17 = dma.hbm_to_vmem [thread:$0]  %s214_s0, 512, %s15_s7, [#allocation3]  }
  0x11   :  { %174 = dma.done.wait [#allocation3], 512  }
  0x12   :  { %175 = vsyncadd [#allocation3], 4294966784  ;;  %v21_v0 = vld [vmem:[#allocation2] sm:$0xff]  ;;  %v22_v1 = vld [vmem:[#allocation2 + $0x8] sm:$0xff]  ;;  %s179_s0 = smov [#allocation5]  }
  0x13   :  { %v23_v2 = vld [vmem:[#allocation2 + $0x10] sm:$0xff]  ;;  %v25_v3 = vrot.slane %v21_v0, 4  ;;  %v31_v4 = vrot.slane %v22_v1, 4  ;;  %v24_v6 = vld [vmem:[#allocation2 + $0x18] sm:$0xff]  ;;  %s103_s18 = sshll.u32 %s179_s0, 4  ;;  %s104_s18 = int_to_ptr.vmem [resolvable:$true] %s103_s18 }
  0x14   :  { %v37_v5 = vrot.slane %v23_v2, 4  ;;  %v43_v7 = vrot.slane %v24_v6, 4  ;;  %s152_s19 = scalar_lea.vmem %s104_s18, 512  ;;  %p157_p9 = scmp.lt.s32.totalorder %s104_s18, %s104_s18 }
  0x15   :  { %v26_v8 = vmax.f32 %v21_v0, %v25_v3  ;;  %v32_v9 = vmax.f32 %v22_v1, %v31_v4  ;;  %p153_p8 = scmp.ne.s32.totalorder %s104_s18, %s152_s19  ;;  %p158_p10 = scmp.lt.s32.totalorder %s152_s19, %s152_s19 }
  0x16   :  { %v38_v10 = vmax.f32 %v23_v2, %v37_v5  ;;  %v44_v11 = vmax.f32 %v24_v6, %v43_v7 }
  0x17   :  { %v27_v12 = vrot.slane %v26_v8, 2  ;;  %v33_v13 = vrot.slane %v32_v9, 2  ;;  %p159_p11 = por %p158_p10, %p157_p9 }
  0x18   :  { %v39_v14 = vrot.slane %v38_v10, 2  ;;  %v45_v15 = vrot.slane %v44_v11, 2 }
  0x19   :  { %v28_v16 = vmax.f32 %v26_v8, %v27_v12  ;;  %v34_v17 = vmax.f32 %v32_v9, %v33_v13  ;;  %p160_p12 = pnand %p159_p11, %p153_p8 }
  0x1a   :  { %v40_v18 = vmax.f32 %v38_v10, %v39_v14  ;;  %v46_v19 = vmax.f32 %v44_v11, %v45_v15 }
  0x1b   :  { %v29_v20 = vrot.slane %v28_v16, 1  ;;  %v35_v21 = vrot.slane %v34_v17, 1 }
  0x1c   :  { %v41_v22 = vrot.slane %v40_v18, 1  ;;  %v47_v23 = vrot.slane %v46_v19, 1 }
  0x1d   :  { %v30_v24 = vmax.f32 %v28_v16, %v29_v20  ;;  %v36_v25 = vmax.f32 %v34_v17, %v35_v21 }
  0x1e   :  { %v42_v26 = vmax.f32 %v40_v18, %v41_v22  ;;  %v48_v27 = vmax.f32 %v46_v19, %v47_v23 }
  0x1f   :  { %v49_v28 = vsub.f32 %v21_v0, %v30_v24  ;;  %v50_v29 = vsub.f32 %v22_v1, %v36_v25 }
  0x20   :  { %v51_v30 = vsub.f32 %v23_v2, %v42_v26  ;;  %v52_v31 = vsub.f32 %v24_v6, %v48_v27 }
  0x21   :  { %v53_v32 = vmul.f32 1.442695, %v49_v28  ;;  %v55_v33 = vmul.f32 1.442695, %v50_v29 }
  0x22   :  { %v57_v34 = vmul.f32 1.442695, %v51_v30  ;;  %v59_v35 = vmul.f32 1.442695, %v52_v31 }
  0x23   :  { %114 = vpow2.f32 %v53_v32 }
  0x24   :  { %116 = vpow2.f32 %v55_v33 }
  0x25   :  { %118 = vpow2.f32 %v57_v34 }
  0x26   :  { %120 = vpow2.f32 %v59_v35 }
  0x2d   :  { %v115_v36 = vpop.eup %114 }
  0x2e   :  { %v117_v37 = vpop.eup %116  ;;  %v61_v38 = vrot.slane %v115_v36, 4 }
  0x2f   :  { %v119_v39 = vpop.eup %118  ;;  %v67_v40 = vrot.slane %v117_v37, 4 }
  0x30   :  { %v121_v41 = vpop.eup %120  ;;  %v62_v42 = vadd.f32 %v115_v36, %v61_v38  ;;  %v73_v43 = vrot.slane %v119_v39, 4 }
  0x31   :  { %v68_v44 = vadd.f32 %v117_v37, %v67_v40  ;;  %v79_v45 = vrot.slane %v121_v41, 4 }
  0x32   :  { %v63_v46 = vrot.slane %v62_v42, 2  ;;  %v74_v47 = vadd.f32 %v119_v39, %v73_v43 }
  0x33   :  { %v69_v48 = vrot.slane %v68_v44, 2  ;;  %v80_v49 = vadd.f32 %v121_v41, %v79_v45 }
  0x34   :  { %v64_v50 = vadd.f32 %v63_v46, %v62_v42  ;;  %v75_v51 = vrot.slane %v74_v47, 2 }
  0x35   :  { %v70_v52 = vadd.f32 %v69_v48, %v68_v44  ;;  %v81_v53 = vrot.slane %v80_v49, 2 }
  0x36   :  { %v65_v54 = vrot.slane %v64_v50, 1  ;;  %v76_v55 = vadd.f32 %v75_v51, %v74_v47 }
  0x37   :  { %v71_v56 = vrot.slane %v70_v52, 1  ;;  %v82_v57 = vadd.f32 %v81_v53, %v80_v49 }
  0x38   :  { %v66_v58 = vadd.f32 %v65_v54, %v64_v50  ;;  %v77_v59 = vrot.slane %v76_v55, 1 }
  0x39   :  { %v72_v60 = vadd.f32 %v71_v56, %v70_v52  ;;  %v83_v61 = vrot.slane %v82_v57, 1 }
  0x3a   :  { %122 = vrcp.f32 %v66_v58  ;;  %v78_v62 = vadd.f32 %v77_v59, %v76_v55 }
  0x3b   :  { %124 = vrcp.f32 %v72_v60  ;;  %v84_v63 = vadd.f32 %v83_v61, %v82_v57 }
  0x3c   :  { %126 = vrcp.f32 %v78_v62 }
  0x3d   :  { %128 = vrcp.f32 %v84_v63 }
  0x44   :  { %v123_v0 = vpop.eup %122 }
  0x45   :  { %v125_v1 = vpop.eup %124  ;;  %v86_v2 = vmul.f32 %v123_v0, %v115_v36 }
  0x46   :  { %v127_v3 = vpop.eup %126  ;;  %v88_v4 = vmul.f32 %v125_v1, %v117_v37 }
  0x47   :  { %v129_v5 = vpop.eup %128  ;;  %93 = vst [vmem:[#allocation5] sm:$0xff] %v86_v2  ;;  %v90_v6 = vmul.f32 %v127_v3, %v119_v39 }
  0x48   :  { %94 = vst [vmem:[#allocation5 + $0x8] sm:$0xff] %v88_v4  ;;  %v92_v7 = vmul.f32 %v129_v5, %v121_v41 }
  0x49   :  { %95 = vst [vmem:[#allocation5 + $0x10] sm:$0xff] %v90_v6 }
  0x4a   :  { %96 = vst [vmem:[#allocation5 + $0x18] sm:$0xff] %v92_v7 }
  0x4b   :  { %163 = shalt.err (!%p160_p12)
}
  0x4c   :  { %s164_s22 = scalar_lea.hbm %s215_s1, 512 }
  0x4d   :  { %p165_p13 = scmp.ne.s32.totalorder %s215_s1, %s164_s22  ;;  %p168_p0 = scmp.lt.u32.totalorder %s164_s22, %s215_s1 }
  0x4f   :  { %p170_p1 = pnand %p168_p0, %p165_p13 }
  0x51   :  { %173 = shalt.err (!%p170_p1)
}
  0x52   :  { %106 = dma.vmem_to_hbm [thread:$0]  %s104_s18, 512, %s215_s1, [#allocation4]  }
  0x53   :  { %176 = dma.done.wait [#allocation4], 512  }
  0x54   :  { %177 = vsyncadd [#allocation4], 4294966784 }
  0x55   :  { %110 = vsyncpa [#allocation3], 1 }
  0x56   :  { %111 = vsyncpa [#allocation4], 1 }

</bundles_post_ra>
